<compile_context>
chip_gen: v7x
topology: tpu7x:2x2x1
jax: 0.10.0
libtpu: 0.0.40
codegen_flags: <defaults>
</compile_context>

<pallas_src>
import functools

import jax
import jax.numpy as jnp
from jax.experimental import pallas as pl
from jax.experimental.pallas import tpu as pltpu

LANE = 128            # vreg lane width (last-dim physical tiling unit)
SUBLANE = 8           # vreg sublane count (second-to-last-dim tiling unit)
MAX_TM = 4096         # batch-tile ceiling; large tiles amortize per-grid-step overhead
SPLIT_MIN_ROWS = 512  # only force >=2 batch grid steps when each half has >= this many rows


def _round_up(x, m):
    return (x + m - 1) // m * m


def _cdiv(a, b):
    return (a + b - 1) // b


@functools.lru_cache(maxsize=1)
def _vmem_budget_bytes():
    """Generation-aware VMEM budget, also used as the explicit vmem_limit_bytes.

    Half of physical VMEM: 64 MiB on v5e/v6e (128 MiB physical -- we raise the
    16/32 MiB scoped default explicitly), 32 MiB on v7x (64 MiB physical).
    Falls back to a conservative 32 MiB if the hardware query is unavailable.
    """
    phys = 64 << 20
    try:
        info = pltpu.get_tpu_info()
        phys = int(getattr(info, "vmem_capacity_bytes", phys))
    except Exception:
        pass
    return max(16 << 20, min(phys // 2, 64 << 20))


def prepare_weight(weight, dtype=None):
    """One-time conversion of a PyTorch nn.Linear weight for the kernel.

    weight: (out_dim, in_dim) -> returns (in_dim, n_pad) with n_pad = out_dim
    rounded up to 128 lanes (256 once out_dim > 128, feeding the 256-wide
    v6e/v7x MXU).  Transpose + lane padding happen once, off the hot path, so
    every kernel output store is lane-dense.  Pass dtype=jnp.bfloat16 to halve
    HBM traffic / resident VMEM (precision change; f32 accumulation is kept).
    """
    out_dim, in_dim = weight.shape
    n_unit = LANE if out_dim <= LANE else 2 * LANE
    n_pad = _round_up(out_dim, n_unit)
    wt = weight.T  # (in_dim, out_dim)
    if n_pad != out_dim:
        wt = jnp.pad(wt, ((0, 0), (0, n_pad - out_dim)))
    if dtype is not None:
        wt = wt.astype(dtype)
    return wt


def _pick_tiles(batch, in_dim, n_pad, x_bytes, w_bytes):
    """Choose (tm, tn) from *physical* VMEM footprints against the budget."""
    budget = _vmem_budget_bytes()
    in_phys = _round_up(in_dim, LANE)     # x last dim physically pads to 128 lanes
    in_sub = _round_up(in_dim, SUBLANE)   # weight second-to-last dim pads to 8 sublanes

    # N tile: keep the whole (double-buffered) weight VMEM-resident if it fits
    # in half the budget; otherwise tile the output-feature dimension.
    tn = n_pad
    if 2 * in_sub * tn * w_bytes > budget // 2:
        tn = (budget // 2) // (2 * in_sub * w_bytes)
        tn = min(n_pad, max(LANE, (tn // LANE) * LANE))
    w_resident = 2 * in_sub * tn * w_bytes

    # Batch tile: remaining budget over the double-buffered x and output tiles.
    per_row = 2 * (in_phys * x_bytes + tn * x_bytes)
    avail = max(budget - w_resident, per_row * SUBLANE)
    tm = (avail // per_row) // SUBLANE * SUBLANE
    tm = max(SUBLANE, min(MAX_TM, tm))
    # v7x megacore: keep >=2 batch grid steps once the batch is big enough that
    # each half still amortizes the per-step overhead.
    if batch >= 2 * SPLIT_MIN_ROWS:
        tm = min(tm, _round_up(_cdiv(batch, 2), SUBLANE))
    tm = min(tm, _round_up(batch, SUBLANE))
    return int(tm), int(tn)


def _qnet_kernel(x_ref, wt_ref, o_ref):
    # x_ref: (tm, in_dim)  wt_ref: (in_dim, tn)  o_ref: (tm, tn), tn % 128 == 0.
    # Single MXU matmul per tile, explicit f32 accumulation.
    x = x_ref[...].astype(wt_ref.dtype)  # no-op for f32 weights; cast if bf16 prepared
    o_ref[...] = jnp.dot(
        x, wt_ref[...], preferred_element_type=jnp.float32
    ).astype(o_ref.dtype)


@functools.partial(jax.jit, static_argnames=("out_dim",))
def qnetwork_forward(x, weight_prepared, out_dim):
    """Forward pass of QNetwork.

    x:                (batch, in_dim)
    weight_prepared:  (in_dim, n_pad) from prepare_weight()
    out_dim:          original (unpadded) output feature count (static)
    returns           (batch, out_dim), same dtype as x
    """
    batch, in_dim = x.shape
    in_dim_w, n_pad = weight_prepared.shape
    assert in_dim == in_dim_w
    assert n_pad % LANE == 0 and n_pad >= out_dim

    tm, tn = _pick_tiles(
        batch, in_dim, n_pad,
        x_bytes=x.dtype.itemsize,
        w_bytes=weight_prepared.dtype.itemsize,
    )
    grid = (_cdiv(batch, tm), _cdiv(n_pad, tn))

    out = pl.pallas_call(
        _qnet_kernel,
        out_shape=jax.ShapeDtypeStruct((batch, n_pad), x.dtype),
        grid=grid,
        in_specs=[
            # x: one (tm, in_dim) tile per batch step, auto double-buffered.
            # Index is independent of j, so the tile is reused across the inner
            # N loop.  The ragged last batch tile is masked by Pallas -- no
            # wrapper-side jnp.pad copy of x on the hot path.
            pl.BlockSpec((tm, in_dim), lambda i, j: (i, 0)),
            # weight: (in_dim, tn).  For small layers tn == n_pad, grid_n == 1,
            # the block index is constant and the weight is fetched once and
            # stays VMEM-resident across all batch tiles.
            pl.BlockSpec((in_dim, tn), lambda i, j: (0, j)),
        ],
        out_specs=pl.BlockSpec((tm, tn), lambda i, j: (i, j)),
        compiler_params=pltpu.CompilerParams(
            # Batch and output-feature tiles are independent -> shardable
            # across v7x's 2 TensorCores (neutral on v5e/v6e).
            dimension_semantics=("parallel", "parallel"),
            vmem_limit_bytes=_vmem_budget_bytes(),
        ),
    )(x, weight_prepared)

    # Strip the output-feature lane padding (fuses into the jitted call).
    return out[:, :out_dim] if n_pad != out_dim else out


if __name__ == "__main__":
    # Small shapes consistent with QNetwork(in_dim, out_dim).
    batch, in_dim, out_dim = 8, 32, 16

    key = jax.random.PRNGKey(0)
    kx, kw = jax.random.split(key)

    x = jax.random.normal(kx, (batch, in_dim), dtype=jnp.float32)
    # Deterministic init mimicking nn.Linear's uniform(-1/sqrt(in_dim), 1/sqrt(in_dim)).
    bound = 1.0 / jnp.sqrt(jnp.float32(in_dim))
    weight = jax.random.uniform(
        kw, (out_dim, in_dim), dtype=jnp.float32, minval=-bound, maxval=bound
    )

    # One-time weight preparation (transpose + lane padding), outside the hot loop.
    # (Use prepare_weight(weight, dtype=jnp.bfloat16) to halve HBM/VMEM traffic;
    # kept f32 here to preserve exact torch semantics.)
    w_prepared = jax.block_until_ready(prepare_weight(weight))

    y = jax.block_until_ready(qnetwork_forward(x, w_prepared, out_dim))

    # Correctness check against plain-JAX reference (same semantics as torch).
    y_ref = x @ weight.T
    assert y.shape == (batch, out_dim)
    assert jnp.allclose(y, y_ref, atol=1e-5, rtol=1e-5)

    print("KERNEL_OK")
</pallas_src>

<mosaic_0001>
module attributes {stable_mosaic.version = 11 : i64} {
  func.func @_qnet_kernel(%arg0: i32, %arg1: i32, %arg2: memref<8x32xf32, #tpu.memory_space<vmem>>, %arg3: memref<32x128xf32, #tpu.memory_space<vmem>>, %arg4: memref<8x128xf32, #tpu.memory_space<vmem>>) attributes {dimension_semantics = [#tpu.dimension_semantics<parallel>, #tpu.dimension_semantics<parallel>], iteration_bounds = array<i64: 1, 1>, scalar_prefetch = 0 : i64, scratch_operands = 0 : i64, tpu.core_type = #tpu.core_type<tc>, window_params = [{transform_indices = @transform_0, window_bounds = array<i64: 8, 32>}, {transform_indices = @transform_1, window_bounds = array<i64: 32, 128>}, {transform_indices = @transform_2, window_bounds = array<i64: 8, 128>}]} {
    %c0 = arith.constant 0 : index
    %c0_0 = arith.constant 0 : index
    %0 = vector.load %arg2[%c0, %c0_0] : memref<8x32xf32, #tpu.memory_space<vmem>>, vector<8x32xf32>
    %c0_1 = arith.constant 0 : index
    %c0_2 = arith.constant 0 : index
    %1 = vector.load %arg3[%c0_1, %c0_2] : memref<32x128xf32, #tpu.memory_space<vmem>>, vector<32x128xf32>
    %cst = arith.constant dense<0.000000e+00> : vector<8x128xf32>
    %2 = tpu.matmul %0, %1, %cst {dimension_numbers = #tpu.dot_dimension_numbers<[1], [0], [0], [1], [0, 0, 1, 1], [], []>} : vector<8x32xf32>, vector<32x128xf32>, vector<8x128xf32> -> vector<8x128xf32>
    %c0_3 = arith.constant 0 : index
    %c0_4 = arith.constant 0 : index
    %3 = vector.load %arg4[%c0_3, %c0_4] : memref<8x128xf32, #tpu.memory_space<vmem>>, vector<8x128xf32>
    tpu.vector_store %arg4[%c0_3, %c0_4], %2 {strides = array<i32>} : memref<8x128xf32, #tpu.memory_space<vmem>>, vector<8x128xf32>,
    return
  }
  func.func @transform_0(%arg0: i32, %arg1: i32) -> (i32, i32) {
    %c0_i32 = arith.constant 0 : i32
    %c0_i32_0 = arith.constant 0 : i32
    return %arg0, %c0_i32 : i32, i32
  }
  func.func @transform_1(%arg0: i32, %arg1: i32) -> (i32, i32) {
    %c0_i32 = arith.constant 0 : i32
    %c0_i32_0 = arith.constant 0 : i32
    return %c0_i32, %arg1 : i32, i32
  }
  func.func @transform_2(%arg0: i32, %arg1: i32) -> (i32, i32) {
    %c0_i32 = arith.constant 0 : i32
    return %arg0, %arg1 : i32, i32
  }
}

</mosaic_0001>

<bundles_post_ra>
// kernel: qnetwork_forward.1
= control target key start
LH: loop header
LB: loop body
LE: loop exit
PB: predicated region body
PF: predicated region fallthrough
CT: control target
= control target key end

     0   :  { %7 = vsyncpa [#allocation3], 0  ;;  %s303_s0 = inlined_call_operand.hbm [shape: f32[8,32], index: 0, kind: input, shape index: {}]   ;;  %s304_s1 = inlined_call_operand.hbm [shape: f32[32,128], index: 1, kind: input, shape index: {}]   ;;  %s305_s2 = inlined_call_operand.hbm [shape: f32[8,128], index: 2, kind: output, shape index: {}]  }
   0x1   :  { %8 = vsyncpa [#allocation6], 0 }
   0x2   :  { %9 = vsyncpa [#allocation4], 0  ;;  %s237_s9 = smov [#allocation2]   ;;  %s238_s11 = smov [#allocation5]  }
   0x3   :  { %s16_s10 = sshll.u32 %s237_s9, 4  ;;  %s25_s12 = sshll.u32 %s238_s11, 4  ;;  %s17_s10 = int_to_ptr.vmem [resolvable:$true] %s16_s10  ;;  %s260_s12 = int_to_ptr.vmem [resolvable:$true] %s25_s12 }
   0x4   :  { %s165_s15 = scalar_lea.hbm %s303_s0, 128 }
   0x5   :  { %p166_p0 = scmp.ne.s32.totalorder %s303_s0, %s165_s15  ;;  %p169_p1 = scmp.lt.u32.totalorder %s165_s15, %s303_s0 }
   0x7   :  { %p171_p2 = pnand %p169_p1, %p166_p0 }
   0x9   :  { %174 = shalt.err (!%p171_p2)
}
   0xa   :  { %s175_s20 = scalar_lea.vmem %s17_s10, 128  ;;  %p180_p4 = scmp.lt.s32.totalorder %s17_s10, %s17_s10 }
   0xb   :  { %p176_p3 = scmp.ne.s32.totalorder %s17_s10, %s175_s20  ;;  %p181_p5 = scmp.lt.s32.totalorder %s175_s20, %s175_s20 }
   0xd   :  { %p182_p6 = por %p181_p5, %p180_p4 }
   0xf   :  { %p183_p7 = pnand %p182_p6, %p176_p3 }
  0x11   :  { %186 = shalt.err (!%p183_p7)
}
  0x12   :  { %19 = dma.hbm_to_vmem [thread:$0]  %s303_s0, 128, %s17_s10, [#allocation3]  }
  0x13   :  { %s187_s25 = scalar_lea.hbm %s304_s1, 512 }
  0x14   :  { %p188_p8 = scmp.ne.s32.totalorder %s304_s1, %s187_s25  ;;  %p191_p9 = scmp.lt.u32.totalorder %s187_s25, %s304_s1 }
  0x16   :  { %p193_p10 = pnand %p191_p9, %p188_p8 }
  0x18   :  { %196 = shalt.err (!%p193_p10)
}
  0x19   :  { %s197_s30 = scalar_lea.vmem %s260_s12, 512  ;;  %p202_p12 = scmp.lt.s32.totalorder %s260_s12, %s260_s12 }
  0x1a   :  { %p198_p11 = scmp.ne.s32.totalorder %s260_s12, %s197_s30  ;;  %p203_p13 = scmp.lt.s32.totalorder %s197_s30, %s197_s30 }
  0x1c   :  { %p204_p0 = por %p203_p13, %p202_p12 }
  0x1e   :  { %p205_p1 = pnand %p204_p0, %p198_p11 }
  0x20   :  { %208 = shalt.err (!%p205_p1)
}
  0x21   :  { %s239_s0 = smov 128   ;;  %s240_s3 = smov 8  }
  0x22   :  { %31 = dma.hbm_to_vmem [thread:$0]  %s304_s1, 512, %s260_s12, [#allocation6], %s239_s0, %s239_s0, %s240_s3  }
  0x23   :  { %231 = dma.done.wait [#allocation3], 128  }
  0x24   :  { %232 = vsyncadd [#allocation3], 4294967168 }
  0x25   :  { %233 = dma.done.wait [#allocation6], 512  }
  0x26   :  { %234 = vsyncadd [#allocation6], 4294966784  ;;  %v241_v0 = vmov 0.0|0.0   ;;  %vm242_vm0 = vmmov 0   ;;  %v243_v1 = vmov 0.0   ;;  %v39_v2 = vld [vmem:[#allocation5] sm:$0xff] }
  0x27   :  { %151 = vmatprep.subr.bf16.mxu0 %v241_v0  ;;  %148 = vmatprep.mubr.msk.f32.mxu0 %vm242_vm0, %v243_v1  ;;  %v40_v3 = vld [vmem:[#allocation5 + $0x8] sm:$0xff]  ;;  %v41_v4 = vld [vmem:[#allocation5 + $0x10] sm:$0xff]  ;;  %v42_v6 = vld [vmem:[#allocation5 + $0x18] sm:$0xff]  ;;  %vm43_vm1 = vcmask 261120   ;;  %s244_s1 = smov [#allocation7]  }
  0x28   :  { %v152_v5 = vpack.c.bf16 %v40_v3, %v39_v2  ;;  %v155_v7 = vpack.c.bf16 %v42_v6, %v41_v4  ;;  %v38_v8 = vld [vmem:[#allocation2] sm:$0xff]  ;;  %s124_s6 = sshll.u32 %s244_s1, 4  ;;  %s125_s6 = int_to_ptr.vmem [resolvable:$true] %s124_s6 }
  0x29   :  { %s209_s7 = scalar_lea.vmem %s125_s6, 128  ;;  %p214_p3 = scmp.lt.s32.totalorder %s125_s6, %s125_s6 }
  0x2a   :  { %153 = vmatpush3.bf16.msra.mxu0 %v152_v5  ;;  %p210_p2 = scmp.ne.s32.totalorder %s125_s6, %s209_s7  ;;  %p215_p4 = scmp.lt.s32.totalorder %s209_s7, %s209_s7 }
  0x2b   :  { %154 = vmatprep.subr.bf16.mxu0 %v241_v0 }
  0x2c   :  { %p216_p5 = por %p215_p4, %p214_p3 }
  0x2e   :  { %156 = vmatpush3.bf16.msra.mxu0 %v155_v7  ;;  %p217_p6 = pnand %p216_p5, %p210_p2 }
  0x31   :  { %149 = vmatmul.mubr.msk.f32.vlgmr.msra.gmra.mrb[0].mxu0 %vm43_vm1, %v38_v8 }
 0x104   :  { %v113_v9 = vpop.f32.mrb[0].mxu0 }
 0x105   :  { %117 = vst [vmem:[#allocation7] sm:$0xff] %v113_v9  ;;  %v150_v10 = vpop.f32.mrb[1].mxu0 }
 0x106   :  { %220 = shalt.err (!%p217_p6)
}
 0x107   :  { %s221_s10 = scalar_lea.hbm %s305_s2, 128 }
 0x108   :  { %p222_p7 = scmp.ne.s32.totalorder %s305_s2, %s221_s10  ;;  %p225_p8 = scmp.lt.u32.totalorder %s221_s10, %s305_s2 }
 0x10a   :  { %p227_p9 = pnand %p225_p8, %p222_p7 }
 0x10c   :  { %230 = shalt.err (!%p227_p9)
}
 0x10d   :  { %127 = dma.vmem_to_hbm [thread:$0]  %s125_s6, 128, %s305_s2, [#allocation4]  }
 0x10e   :  { %235 = dma.done.wait [#allocation4], 128  }
 0x10f   :  { %236 = vsyncadd [#allocation4], 4294967168 }
 0x110   :  { %131 = vsyncpa [#allocation3], 1 }
 0x111   :  { %132 = vsyncpa [#allocation6], 1 }
 0x112   :  { %133 = vsyncpa [#allocation4], 1 }

</bundles_post_ra>
